<compile_context>
chip_gen: v7x
topology: tpu7x:2x2x1
jax: 0.10.0
libtpu: 0.0.40
codegen_flags: <defaults>
</compile_context>

<pallas_src>
import jax
import jax.numpy as jnp
from jax.experimental import pallas as pl
from jax.experimental.pallas import tpu as pltpu

SUB = 8      # f32 sublane tile
LANE = 128   # lane tile
F_IN = 2     # layer1 input features
HIDDEN = 8   # layer1 output / layer2 input features

# Packed-parameter tile column layout (hidden dim on sublanes):
#   col 0: w1[0, :]   col 1: w1[1, :]   col 2: b1   col 3: w2[:, 0]   col 4: b2
COL_W1_0, COL_W1_1, COL_B1, COL_W2, COL_B2 = 0, 1, 2, 3, 4


def mlp_kernel(x_ref, p_ref, o_ref):
    # x_ref: (F_IN, B) f32  -- batch on lanes, input features on sublanes.
    # p_ref: (SUB, LANE) f32 -- all parameters packed into one vreg tile.
    # o_ref: (1, B) f32     -- single output feature, batch on lanes.
    w1c0 = p_ref[:, COL_W1_0:COL_W1_0 + 1]   # (8, 1)
    w1c1 = p_ref[:, COL_W1_1:COL_W1_1 + 1]   # (8, 1)
    b1c = p_ref[:, COL_B1:COL_B1 + 1]        # (8, 1)
    w2c = p_ref[:, COL_W2:COL_W2 + 1]        # (8, 1)
    b2 = p_ref[0:1, COL_B2:COL_B2 + 1]       # (1, 1)

    x0 = x_ref[0:1, :]                       # (1, B)
    x1 = x_ref[1:2, :]                       # (1, B)

    # Layer 1 on the VPU: h[j, b] = w1[0,j]*x[b,0] + w1[1,j]*x[b,1] + b1[j]
    h = w1c0 * x0 + w1c1 * x1 + b1c          # (8, B)
    h = jnp.maximum(h, 0.0)                  # ReLU

    # Layer 2: elementwise multiply + 8-wide sublane reduce (XLU) + scalar bias.
    y = jnp.sum(h * w2c, axis=0, keepdims=True) + b2   # (1, B)
    o_ref[...] = y.astype(o_ref.dtype)


def pack_params(w1, b1, w2, b2):
    """Pack all parameters into one (8, 128) f32 tile.  Call ONCE at init."""
    p = jnp.zeros((SUB, LANE), jnp.float32)
    p = p.at[:HIDDEN, COL_W1_0].set(w1[0, :].astype(jnp.float32))
    p = p.at[:HIDDEN, COL_W1_1].set(w1[1, :].astype(jnp.float32))
    p = p.at[:HIDDEN, COL_B1].set(b1.reshape(-1).astype(jnp.float32))
    p = p.at[:HIDDEN, COL_W2].set(w2.reshape(-1).astype(jnp.float32))
    p = p.at[0, COL_B2].set(jnp.asarray(b2, jnp.float32).reshape(()))
    return p


@jax.jit
def my_neural_net(x, params_packed):
    """x: (B, 2) f32; params_packed: (8, 128) f32 from pack_params -> (B, 1)."""
    B, f_in = x.shape
    if f_in != F_IN:
        raise ValueError(f"expected {F_IN} input features, got {f_in}")
    if B > LANE:
        # TODO(synk): add a batch grid axis (dimension_semantics=("parallel",))
        # if batch ever exceeds one lane tile.
        raise ValueError(f"batch {B} > {LANE} not supported by this kernel")

    x_t = x.astype(jnp.float32).T            # (2, B): batch on lanes

    out = pl.pallas_call(
        mlp_kernel,
        out_shape=jax.ShapeDtypeStruct((1, B), jnp.float32),
        in_specs=[
            pl.BlockSpec(memory_space=pltpu.MemorySpace.VMEM),   # x (2, B)
            pl.BlockSpec(memory_space=pltpu.MemorySpace.VMEM),   # packed params
        ],
        out_specs=pl.BlockSpec(memory_space=pltpu.MemorySpace.VMEM),
        cost_estimate=pl.CostEstimate(
            flops=B * (2 * F_IN * HIDDEN + 2 * HIDDEN + 2),
            transcendentals=0,
            bytes_accessed=4 * (F_IN * B + SUB * LANE + B),
        ),
    )(x_t, params_packed)

    return out.T                             # (B, 1)


def init_params(key):
    """Deterministic init mimicking nn.Linear shapes.

    layer1: weight (8, 2), bias (8,)  -> stored as w1 (2, 8), b1 (1, 8)
    layer2: weight (1, 8), bias (1,)  -> stored as w2 (8, 1), b2 (1, 1)
    """
    k1, k2, k3, k4 = jax.random.split(key, 4)
    bound1 = 1.0 / jnp.sqrt(2.0)
    w1 = jax.random.uniform(k1, (F_IN, HIDDEN), jnp.float32, -bound1, bound1)
    b1 = jax.random.uniform(k2, (1, HIDDEN), jnp.float32, -bound1, bound1)
    bound2 = 1.0 / jnp.sqrt(8.0)
    w2 = jax.random.uniform(k3, (HIDDEN, 1), jnp.float32, -bound2, bound2)
    b2 = jax.random.uniform(k4, (1, 1), jnp.float32, -bound2, bound2)
    return w1, b1, w2, b2


if __name__ == "__main__":
    key = jax.random.PRNGKey(0)
    # Same data as the PyTorch snippet: x = [[1,2],[3,4],[5,6],[7,8]], shape (4, 2)
    x = jnp.array([[1.0, 2.0], [3.0, 4.0], [5.0, 6.0], [7.0, 8.0]],
                  dtype=jnp.float32)

    w1, b1, w2, b2 = init_params(key)
    params_packed = pack_params(w1, b1, w2, b2)   # built once, reused per call

    out = my_neural_net(x, params_packed)
    out = jax.block_until_ready(out)

    # Reference check in plain JAX (same math as the PyTorch forward).
    ref = jnp.maximum(x @ w1 + b1, 0.0) @ w2 + b2
    assert out.shape == (4, 1), out.shape
    assert jnp.allclose(out, ref, atol=1e-5, rtol=1e-5), (out, ref)

    print("KERNEL_OK")
</pallas_src>

<mosaic_0001>
module attributes {stable_mosaic.version = 11 : i64} {
  func.func @mlp_kernel(%arg0: memref<2x4xf32, #tpu.memory_space<vmem>>, %arg1: memref<8x128xf32, #tpu.memory_space<vmem>>, %arg2: memref<1x4xf32, #tpu.memory_space<vmem>>) attributes {dimension_semantics = [], scalar_prefetch = 0 : i64, scratch_operands = 0 : i64, tpu.core_type = #tpu.core_type<tc>} {
    %c0 = arith.constant 0 : index
    %c0_0 = arith.constant 0 : index
    %0 = vector.load %arg1[%c0, %c0_0] : memref<8x128xf32, #tpu.memory_space<vmem>>, vector<8x1xf32>
    %c0_1 = arith.constant 0 : index
    %c1 = arith.constant 1 : index
    %1 = vector.load %arg1[%c0_1, %c1] : memref<8x128xf32, #tpu.memory_space<vmem>>, vector<8x1xf32>
    %c0_2 = arith.constant 0 : index
    %c2 = arith.constant 2 : index
    %2 = vector.load %arg1[%c0_2, %c2] : memref<8x128xf32, #tpu.memory_space<vmem>>, vector<8x1xf32>
    %c0_3 = arith.constant 0 : index
    %c3 = arith.constant 3 : index
    %3 = vector.load %arg1[%c0_3, %c3] : memref<8x128xf32, #tpu.memory_space<vmem>>, vector<8x1xf32>
    %c0_4 = arith.constant 0 : index
    %c4 = arith.constant 4 : index
    %4 = vector.load %arg1[%c0_4, %c4] : memref<8x128xf32, #tpu.memory_space<vmem>>, vector<1x1xf32>
    %c0_5 = arith.constant 0 : index
    %c0_6 = arith.constant 0 : index
    %5 = vector.load %arg0[%c0_5, %c0_6] : memref<2x4xf32, #tpu.memory_space<vmem>>, vector<1x4xf32>
    %c1_7 = arith.constant 1 : index
    %c0_8 = arith.constant 0 : index
    %6 = vector.load %arg0[%c1_7, %c0_8] : memref<2x4xf32, #tpu.memory_space<vmem>>, vector<1x4xf32>
    %7 = vector.broadcast %0 : vector<8x1xf32> to vector<8x4xf32>
    %8 = vector.broadcast %5 : vector<1x4xf32> to vector<8x4xf32>
    %9 = arith.mulf %7, %8 : vector<8x4xf32>
    %10 = vector.broadcast %1 : vector<8x1xf32> to vector<8x4xf32>
    %11 = vector.broadcast %6 : vector<1x4xf32> to vector<8x4xf32>
    %12 = arith.mulf %10, %11 : vector<8x4xf32>
    %13 = arith.addf %9, %12 : vector<8x4xf32>
    %14 = vector.broadcast %2 : vector<8x1xf32> to vector<8x4xf32>
    %15 = arith.addf %13, %14 : vector<8x4xf32>
    %cst = arith.constant 0.000000e+00 : f32
    %16 = vector.broadcast %cst : f32 to vector<8x4xf32>
    %17 = arith.maximumf %15, %16 : vector<8x4xf32>
    %18 = vector.broadcast %3 : vector<8x1xf32> to vector<8x4xf32>
    %19 = arith.mulf %17, %18 : vector<8x4xf32>
    %cst_9 = arith.constant dense<0.000000e+00> : vector<4xf32>
    %20 = vector.multi_reduction <add>, %19, %cst_9 [0] : vector<8x4xf32> to vector<4xf32>
    %21 = vector.shape_cast %20 : vector<4xf32> to vector<1x4xf32>
    %22 = vector.broadcast %4 : vector<1x1xf32> to vector<1x4xf32>
    %23 = arith.addf %21, %22 : vector<1x4xf32>
    %c0_10 = arith.constant 0 : index
    %c0_11 = arith.constant 0 : index
    %24 = vector.load %arg2[%c0_10, %c0_11] : memref<1x4xf32, #tpu.memory_space<vmem>>, vector<1x4xf32>
    tpu.vector_store %arg2[%c0_10, %c0_11], %23 {strides = array<i32>} : memref<1x4xf32, #tpu.memory_space<vmem>>, vector<1x4xf32>,
    return
  }
}

</mosaic_0001>

<bundles_post_ra>
// kernel: my_neural_net.1
= control target key start
LH: loop header
LB: loop body
LE: loop exit
PB: predicated region body
PF: predicated region fallthrough
CT: control target
= control target key end

     0   :  { %7 = vsyncpa [#allocation3], 0  ;;  %s205_s0 = inlined_call_operand.vmem [shape: f32[2,4], index: 0, kind: input, shape index: {}]   ;;  %s206_s1 = inlined_call_operand.hbm [shape: f32[8,128], index: 1, kind: input, shape index: {}]   ;;  %s207_s2 = inlined_call_operand.hbm [shape: f32[1,4], index: 2, kind: output, shape index: {}]  }
   0x1   :  { %8 = vsyncpa [#allocation4], 0  ;;  %s153_s9 = smov [#allocation2]   ;;  %s105_s13 = scalar_lea.hbm %s206_s1, 128 }
   0x2   :  { %s17_s10 = sshll.u32 %s153_s9, 4  ;;  %p106_p0 = scmp.ne.s32.totalorder %s206_s1, %s105_s13  ;;  %s18_s10 = int_to_ptr.vmem [resolvable:$true] %s17_s10 }
   0x3   :  { %p109_p1 = scmp.lt.u32.totalorder %s105_s13, %s206_s1 }
   0x5   :  { %p111_p2 = pnand %p109_p1, %p106_p0 }
   0x7   :  { %114 = shalt.err (!%p111_p2)
}
   0x8   :  { %s115_s18 = scalar_lea.vmem %s18_s10, 128  ;;  %p120_p4 = scmp.lt.s32.totalorder %s18_s10, %s18_s10 }
   0x9   :  { %p116_p3 = scmp.ne.s32.totalorder %s18_s10, %s115_s18  ;;  %p121_p5 = scmp.lt.s32.totalorder %s115_s18, %s115_s18 }
   0xb   :  { %p122_p6 = por %p121_p5, %p120_p4 }
   0xd   :  { %p123_p7 = pnand %p122_p6, %p116_p3 }
   0xf   :  { %126 = shalt.err (!%p123_p7)
}
  0x10   :  { %20 = dma.hbm_to_vmem [thread:$0]  %s206_s1, 128, %s18_s10, [#allocation3]  }
  0x11   :  { %149 = dma.done.wait [#allocation3], 128  }
  0x12   :  { %150 = vsyncadd [#allocation3], 4294967168  ;;  %v154_v0 = vmov 0   ;;  %v155_v1 = vmov 2   ;;  %v24_v2 = vld [vmem:[#allocation2] sm:$0xff]  ;;  %v156_v3 = vmov 1  }
  0x13   :  { %99 = vset.pattern.permute.xlu0 %v154_v0  ;;  %101 = vset.pattern.permute.xlu1 %v155_v1  ;;  %v157_v4 = vmov 3   ;;  %v25_v5 = vld [vmem:[#allocation2] sm:$0x1]  ;;  %v158_v6 = vmov 4   ;;  %v91_v9 = vld [vmem:[%s205_s0 + $0x1] ss:$0 sm:$0xff] }
  0x14   :  { %30 = vperm.xlu0 %99, %v24_v2   ;;  %49 = vperm.xlu1 %101, %v24_v2   ;;  %v90_v8 = vld [vmem:[%s205_s0] ss:$0 sm:$0xff]  ;;  %vm59_vm0 = vcmask 31744   ;;  %s159_s24 = smov [#allocation5]   ;;  %vm73_vm1 = vcmask 24576  }
  0x15   :  { %s81_s25 = sshll.u32 %s159_s24, 4  ;;  %s82_s25 = int_to_ptr.vmem [resolvable:$true] %s81_s25 }
  0x16   :  { %s127_s0 = scalar_lea.vmem %s82_s25, 16  ;;  %s131_s26 = scalar_lea.vmem %s82_s25, 32 }
  0x17   :  { %p128_p8 = scmp.ne.s32.totalorder %s82_s25, %s127_s0  ;;  %p132_p9 = scmp.lt.s32.totalorder %s82_s25, %s82_s25 }
  0x18   :  { %100 = vset.pattern.permute.xlu0 %v156_v3  ;;  %102 = vset.pattern.permute.xlu1 %v157_v4  ;;  %p133_p10 = scmp.lt.s32.totalorder %s131_s26, %s127_s0 }
  0x19   :  { %39 = vperm.xlu0 %100, %v24_v2   ;;  %55 = vperm.xlu1 %102, %v24_v2  }
  0x1a   :  { %p134_p11 = por %p133_p10, %p132_p9 }
  0x1c   :  { %p135_p12 = pnand %p134_p11, %p128_p8 }
  0x1d   :  { %103 = vset.pattern.permute.xlu1 %v158_v6  ;;  %104 = vset.pattern.permute.xlu0 %v158_v6 }
  0x1e   :  { %69 = vperm.xlu1 %103, %v25_v5  }
  0x93   :  { %v31_v7 = vpop.permute.xlu0 %30  ;;  %v50_v11 = vpop.permute.xlu1 %49 }
  0x94   :  { %v37_v12 = vmul.f32 %v90_v8, %v31_v7 }
  0x98   :  { %v40_v10 = vpop.permute.xlu0 %39  ;;  %v56_v16 = vpop.permute.xlu1 %55 }
  0x99   :  { %v46_v13 = vmul.f32 %v91_v9, %v40_v10 }
  0x9b   :  { %v47_v14 = vadd.f32 %v46_v13, %v37_v12 }
  0x9d   :  { %v52_v15 = vadd.f32 %v50_v11, %v47_v14  ;;  %v70_v25 = vpop.permute.xlu1 %69 }
  0x9f   :  { %v53_v17 = vmax.f32 %v52_v15, 0.0 }
  0xa1   :  { %v58_v18 = vmul.f32 %v56_v16, %v53_v17 }
  0xa3   :  { %v60_v19 = vsel %vm59_vm0, %v58_v18, 0.0 }
  0xa4   :  { %v61_v20 = vrot.slane %v60_v19, 4 }
  0xa6   :  { %v62_v21 = vadd.f32 %v61_v20, %v60_v19 }
  0xa8   :  { %v63_v22 = vrot.slane %v62_v21, 2 }
  0xaa   :  { %v64_v23 = vadd.f32 %v63_v22, %v62_v21 }
  0xac   :  { %v65_v24 = vrot.slane %v64_v23, 1 }
  0xae   :  { %v66_v26 = vadd.f32 %v65_v24, %v64_v23 }
  0xb0   :  { %v72_v27 = vadd.f32 %v70_v25, %v66_v26 }
  0xb2   :  { %74 = vst.msk [vmem:[#allocation5] sm:$0x1] %vm73_vm1, %v72_v27 }
  0xb3   :  { %138 = shalt.err (!%p135_p12)
}
  0xb4   :  { %s139_s29 = scalar_lea.hbm %s207_s2, 16 }
  0xb5   :  { %p140_p13 = scmp.ne.s32.totalorder %s207_s2, %s139_s29  ;;  %p143_p0 = scmp.lt.u32.totalorder %s139_s29, %s207_s2 }
  0xb7   :  { %p145_p1 = pnand %p143_p0, %p140_p13 }
  0xb9   :  { %148 = shalt.err (!%p145_p1)
}
  0xba   :  { %84 = dma.vmem_to_hbm [thread:$0]  %s82_s25, 16, %s207_s2, [#allocation4]  }
  0xbb   :  { %151 = dma.done.wait [#allocation4], 16  }
  0xbc   :  { %152 = vsyncadd [#allocation4], 4294967280 }
  0xbd   :  { %88 = vsyncpa [#allocation3], 1 }
  0xbe   :  { %89 = vsyncpa [#allocation4], 1 }

</bundles_post_ra>
